<compile_context>
chip_gen: v7x
topology: tpu7x:2x2x1
jax: 0.10.0
libtpu: 0.0.40
codegen_flags: <defaults>
</compile_context>

<pallas_src>
import functools

import jax
import jax.numpy as jnp
import numpy as np
from jax.experimental import pallas as pl
from jax.experimental.pallas import tpu as pltpu

SUBLANE = 8  # f32 sublane granularity for the second-to-last block dim


def _round_up(x, m):
    return (x + m - 1) // m * m


def dqn_kernel(x_ref, w1_ref, b1_ref, w2_ref, b2_ref, w3_ref, b3_ref, out_ref):
    """One batch tile: 3 x (MXU matmul, f32 acc) with bias/ReLU epilogues.

    Weights/biases have constant index maps so they stay VMEM-resident across
    the batch grid; only the x tile and the narrow (tb, action_dim) output
    stream through HBM.
    """
    # Layer 1: Linear(1 + state_dim, 64) + ReLU
    h = jnp.dot(x_ref[...], w1_ref[...], preferred_element_type=jnp.float32)
    h = jnp.maximum(h + b1_ref[...], 0.0)

    # Layer 2: Linear(64, hidden_dim) + ReLU
    h = jnp.dot(h, w2_ref[...], preferred_element_type=jnp.float32)
    h = jnp.maximum(h + b2_ref[...], 0.0)

    # Layer 3: Linear(hidden_dim, action_dim), no activation.
    h = jnp.dot(h, w3_ref[...], preferred_element_type=jnp.float32)
    out_ref[...] = (h + b3_ref[...]).astype(out_ref.dtype)


def _choose_tile(batch, block_batch):
    """Batch tile: a multiple of the f32 sublane width, split into >=2 grid
    steps when the batch allows it (v7x megacore), capped by block_batch."""
    tb = min(block_batch, _round_up(max(batch, 1), SUBLANE))
    if batch >= 2 * SUBLANE:
        tb = min(tb, _round_up(pl.cdiv(batch, 2), SUBLANE))
    return max(tb, SUBLANE)


def dqn_forward(x, params, *, block_batch=2048):
    """x: (batch, 1 + state_dim) float32. Returns (batch, action_dim) float32.

    No wrapper-side padding / casting / slicing: x and the output keep their
    natural shapes; Pallas masks the partial last batch block (grid=cdiv)."""
    w1, b1, w2, b2, w3, b3 = params
    batch, d_in = x.shape
    d1, d2, d3 = w1.shape[1], w2.shape[1], w3.shape[1]

    tb = _choose_tile(batch, block_batch)
    nb = pl.cdiv(batch, tb)

    flops = 2 * batch * (d_in * d1 + d1 * d2 + d2 * d3)
    bytes_accessed = 4 * (batch * (d_in + d3)
                          + d_in * d1 + d1 + d1 * d2 + d2 + d2 * d3 + d3)

    return pl.pallas_call(
        dqn_kernel,
        out_shape=jax.ShapeDtypeStruct((batch, d3), jnp.float32),
        grid=(nb,),
        in_specs=[
            pl.BlockSpec((tb, d_in), lambda i: (i, 0)),   # x: streamed per tile
            pl.BlockSpec((d_in, d1), lambda i: (0, 0)),   # weights / biases:
            pl.BlockSpec((1, d1), lambda i: (0, 0)),      # constant block index
            pl.BlockSpec((d1, d2), lambda i: (0, 0)),     # -> VMEM-resident
            pl.BlockSpec((1, d2), lambda i: (0, 0)),
            pl.BlockSpec((d2, d3), lambda i: (0, 0)),
            pl.BlockSpec((1, d3), lambda i: (0, 0)),
        ],
        # (tb, action_dim) output block: last dim equals the full array dim, so
        # it is legal; writes only the bytes actually needed (~32x less HBM
        # writeback than a 128-lane-padded f32 slab, at the cost of masked vst).
        out_specs=pl.BlockSpec((tb, d3), lambda i: (i, 0)),
        compiler_params=pltpu.CompilerParams(
            dimension_semantics=("parallel",)),
        cost_estimate=pl.CostEstimate(flops=flops, transcendentals=0,
                                      bytes_accessed=bytes_accessed),
    )(x, w1, b1, w2, b2, w3, b3)


def init_params(key, state_dim, action_dim, hidden_dim):
    """nn.Linear-equivalent params stored (in_features, out_features) so the
    kernel computes y = x @ W + b. PyTorch-style U(-1/sqrt(fan_in), ...) init.
    No per-call prep needed: shapes are used as-is by the kernel."""
    dims = [(1 + state_dim, 64), (64, hidden_dim), (hidden_dim, action_dim)]
    params = []
    for fan_in, fan_out in dims:
        key, kw, kb = jax.random.split(key, 3)
        bound = 1.0 / np.sqrt(fan_in)
        w = jax.random.uniform(kw, (fan_in, fan_out), jnp.float32, -bound, bound)
        b = jax.random.uniform(kb, (1, fan_out), jnp.float32, -bound, bound)
        params += [w, b]
    return tuple(params)


def reference_forward(x, params):
    w1, b1, w2, b2, w3, b3 = params
    h1 = jnp.maximum(x @ w1 + b1, 0.0)
    h2 = jnp.maximum(h1 @ w2 + b2, 0.0)
    return h2 @ w3 + b3


if __name__ == "__main__":
    state_dim = 7       # kernel input width = 1 + state_dim = 8
    action_dim = 4
    hidden_dim = 32

    key = jax.random.PRNGKey(0)
    key, kx1, kx2 = jax.random.split(key, 3)
    params = init_params(key, state_dim, action_dim, hidden_dim)

    fwd = jax.jit(functools.partial(dqn_forward, block_batch=2048))

    # Small batch: single grid step.
    x_small = jax.random.normal(kx1, (8, 1 + state_dim), jnp.float32)
    out_small = jax.block_until_ready(fwd(x_small, params))

    # Ragged larger batch: 2 grid steps (tb=136) + masked partial last block.
    x_big = jax.random.normal(kx2, (260, 1 + state_dim), jnp.float32)
    out_big = jax.block_until_ready(fwd(x_big, params))

    assert out_small.shape == (8, action_dim)
    assert out_big.shape == (260, action_dim)

    for x, out in ((x_small, out_small), (x_big, out_big)):
        ref = reference_forward(x, params)
        np.testing.assert_allclose(np.asarray(out), np.asarray(ref),
                                   rtol=2e-2, atol=2e-2)

    print("KERNEL_OK")
</pallas_src>

<mosaic_0001>
module attributes {stable_mosaic.version = 11 : i64} {
  func.func @dqn_kernel(%arg0: i32, %arg1: memref<8x8xf32, #tpu.memory_space<vmem>>, %arg2: memref<8x64xf32, #tpu.memory_space<vmem>>, %arg3: memref<1x64xf32, #tpu.memory_space<vmem>>, %arg4: memref<64x32xf32, #tpu.memory_space<vmem>>, %arg5: memref<1x32xf32, #tpu.memory_space<vmem>>, %arg6: memref<32x4xf32, #tpu.memory_space<vmem>>, %arg7: memref<1x4xf32, #tpu.memory_space<vmem>>, %arg8: memref<8x4xf32, #tpu.memory_space<vmem>>) attributes {dimension_semantics = [#tpu.dimension_semantics<parallel>], iteration_bounds = array<i64: 1>, scalar_prefetch = 0 : i64, scratch_operands = 0 : i64, tpu.core_type = #tpu.core_type<tc>, window_params = [{transform_indices = @transform_0, window_bounds = array<i64: 8, 8>}, {pipeline_mode = #tpu.pipeline_mode<synchronous>, transform_indices = @transform_1, window_bounds = array<i64: 8, 64>}, {pipeline_mode = #tpu.pipeline_mode<synchronous>, transform_indices = @transform_2, window_bounds = array<i64: 1, 64>}, {pipeline_mode = #tpu.pipeline_mode<synchronous>, transform_indices = @transform_3, window_bounds = array<i64: 64, 32>}, {pipeline_mode = #tpu.pipeline_mode<synchronous>, transform_indices = @transform_4, window_bounds = array<i64: 1, 32>}, {pipeline_mode = #tpu.pipeline_mode<synchronous>, transform_indices = @transform_5, window_bounds = array<i64: 32, 4>}, {pipeline_mode = #tpu.pipeline_mode<synchronous>, transform_indices = @transform_6, window_bounds = array<i64: 1, 4>}, {transform_indices = @transform_7, window_bounds = array<i64: 8, 4>}]} {
    %c0 = arith.constant 0 : index
    %c0_0 = arith.constant 0 : index
    %0 = vector.load %arg1[%c0, %c0_0] : memref<8x8xf32, #tpu.memory_space<vmem>>, vector<8x8xf32>
    %c0_1 = arith.constant 0 : index
    %c0_2 = arith.constant 0 : index
    %1 = vector.load %arg2[%c0_1, %c0_2] : memref<8x64xf32, #tpu.memory_space<vmem>>, vector<8x64xf32>
    %cst = arith.constant dense<0.000000e+00> : vector<8x64xf32>
    %2 = tpu.matmul %0, %1, %cst {dimension_numbers = #tpu.dot_dimension_numbers<[1], [0], [0], [1], [0, 0, 1, 1], [], []>} : vector<8x8xf32>, vector<8x64xf32>, vector<8x64xf32> -> vector<8x64xf32>
    %c0_3 = arith.constant 0 : index
    %c0_4 = arith.constant 0 : index
    %3 = vector.load %arg3[%c0_3, %c0_4] : memref<1x64xf32, #tpu.memory_space<vmem>>, vector<1x64xf32>
    %4 = vector.broadcast %3 : vector<1x64xf32> to vector<8x64xf32>
    %5 = arith.addf %2, %4 : vector<8x64xf32>
    %cst_5 = arith.constant 0.000000e+00 : f32
    %6 = vector.broadcast %cst_5 : f32 to vector<8x64xf32>
    %7 = arith.maximumf %5, %6 : vector<8x64xf32>
    %c0_6 = arith.constant 0 : index
    %c0_7 = arith.constant 0 : index
    %8 = vector.load %arg4[%c0_6, %c0_7] : memref<64x32xf32, #tpu.memory_space<vmem>>, vector<64x32xf32>
    %cst_8 = arith.constant dense<0.000000e+00> : vector<8x32xf32>
    %9 = tpu.matmul %7, %8, %cst_8 {dimension_numbers = #tpu.dot_dimension_numbers<[1], [0], [0], [1], [0, 0, 1, 1], [], []>} : vector<8x64xf32>, vector<64x32xf32>, vector<8x32xf32> -> vector<8x32xf32>
    %c0_9 = arith.constant 0 : index
    %c0_10 = arith.constant 0 : index
    %10 = vector.load %arg5[%c0_9, %c0_10] : memref<1x32xf32, #tpu.memory_space<vmem>>, vector<1x32xf32>
    %11 = vector.broadcast %10 : vector<1x32xf32> to vector<8x32xf32>
    %12 = arith.addf %9, %11 : vector<8x32xf32>
    %cst_11 = arith.constant 0.000000e+00 : f32
    %13 = vector.broadcast %cst_11 : f32 to vector<8x32xf32>
    %14 = arith.maximumf %12, %13 : vector<8x32xf32>
    %c0_12 = arith.constant 0 : index
    %c0_13 = arith.constant 0 : index
    %15 = vector.load %arg6[%c0_12, %c0_13] : memref<32x4xf32, #tpu.memory_space<vmem>>, vector<32x4xf32>
    %cst_14 = arith.constant dense<0.000000e+00> : vector<8x4xf32>
    %16 = tpu.matmul %14, %15, %cst_14 {dimension_numbers = #tpu.dot_dimension_numbers<[1], [0], [0], [1], [0, 0, 1, 1], [], []>} : vector<8x32xf32>, vector<32x4xf32>, vector<8x4xf32> -> vector<8x4xf32>
    %c0_15 = arith.constant 0 : index
    %c0_16 = arith.constant 0 : index
    %17 = vector.load %arg7[%c0_15, %c0_16] : memref<1x4xf32, #tpu.memory_space<vmem>>, vector<1x4xf32>
    %18 = vector.broadcast %17 : vector<1x4xf32> to vector<8x4xf32>
    %19 = arith.addf %16, %18 : vector<8x4xf32>
    %c0_17 = arith.constant 0 : index
    %c0_18 = arith.constant 0 : index
    %20 = vector.load %arg8[%c0_17, %c0_18] : memref<8x4xf32, #tpu.memory_space<vmem>>, vector<8x4xf32>
    tpu.vector_store %arg8[%c0_17, %c0_18], %19 {strides = array<i32>} : memref<8x4xf32, #tpu.memory_space<vmem>>, vector<8x4xf32>,
    return
  }
  func.func @transform_0(%arg0: i32) -> (i32, i32) {
    %c0_i32 = arith.constant 0 : i32
    %c0_i32_0 = arith.constant 0 : i32
    return %arg0, %c0_i32 : i32, i32
  }
  func.func @transform_1(%arg0: i32) -> (i32, i32) {
    %c0_i32 = arith.constant 0 : i32
    %c0_i32_0 = arith.constant 0 : i32
    %c0_i32_1 = arith.constant 0 : i32
    return %c0_i32, %c0_i32_0 : i32, i32
  }
  func.func @transform_2(%arg0: i32) -> (i32, i32) {
    %c0_i32 = arith.constant 0 : i32
    %c0_i32_0 = arith.constant 0 : i32
    %c0_i32_1 = arith.constant 0 : i32
    return %c0_i32, %c0_i32_0 : i32, i32
  }
  func.func @transform_3(%arg0: i32) -> (i32, i32) {
    %c0_i32 = arith.constant 0 : i32
    %c0_i32_0 = arith.constant 0 : i32
    %c0_i32_1 = arith.constant 0 : i32
    return %c0_i32, %c0_i32_0 : i32, i32
  }
  func.func @transform_4(%arg0: i32) -> (i32, i32) {
    %c0_i32 = arith.constant 0 : i32
    %c0_i32_0 = arith.constant 0 : i32
    %c0_i32_1 = arith.constant 0 : i32
    return %c0_i32, %c0_i32_0 : i32, i32
  }
  func.func @transform_5(%arg0: i32) -> (i32, i32) {
    %c0_i32 = arith.constant 0 : i32
    %c0_i32_0 = arith.constant 0 : i32
    %c0_i32_1 = arith.constant 0 : i32
    return %c0_i32, %c0_i32_0 : i32, i32
  }
  func.func @transform_6(%arg0: i32) -> (i32, i32) {
    %c0_i32 = arith.constant 0 : i32
    %c0_i32_0 = arith.constant 0 : i32
    %c0_i32_1 = arith.constant 0 : i32
    return %c0_i32, %c0_i32_0 : i32, i32
  }
  func.func @transform_7(%arg0: i32) -> (i32, i32) {
    %c0_i32 = arith.constant 0 : i32
    %c0_i32_0 = arith.constant 0 : i32
    return %arg0, %c0_i32 : i32, i32
  }
}

</mosaic_0001>

<bundles_post_ra>
// kernel: dqn_forward.1
= control target key start
LH: loop header
LB: loop body
LE: loop exit
PB: predicated region body
PF: predicated region fallthrough
CT: control target
= control target key end

     0   :  { %vm35_vm0 = vcmask 64512   ;;  %v369_v0 = vmov 0.0   ;;  %vm370_vm1 = vmmov 0   ;;  %v371_v4 = vmov 0.0|0.0   ;;  %s466_s1 = inlined_call_operand.vmem [shape: f32[8,64], index: 1, kind: input, shape index: {}]   ;;  %s467_s0 = inlined_call_operand.vmem [shape: f32[8,8], index: 0, kind: input, shape index: {}]   ;;  %s468_s3 = inlined_call_operand.vmem [shape: f32[64,32], index: 3, kind: input, shape index: {}]   ;;  %s469_s5 = inlined_call_operand.vmem [shape: f32[32,4], index: 5, kind: input, shape index: {}]   ;;  %s470_s2 = inlined_call_operand.vmem [shape: f32[1,64], index: 2, kind: input, shape index: {}]   ;;  %s471_s4 = inlined_call_operand.vmem [shape: f32[1,32], index: 4, kind: input, shape index: {}]   ;;  %s472_s6 = inlined_call_operand.vmem [shape: f32[1,4], index: 6, kind: input, shape index: {}]   ;;  %s473_s7 = inlined_call_operand.vmem [shape: f32[8,4], index: 7, kind: output, shape index: {}]  }
   0x1   :  { %313 = vmatprep.subr.mxu0 %v369_v0  ;;  %v27_v1 = vld [vmem:[%s466_s1] sm:$0xff]  ;;  %315 = vmatprep.mubr.msk.f32.mxu0 %vm370_vm1, %v369_v0  ;;  %v111_v5 = vld [vmem:[%s468_s3 + $0x8] sm:$0xff]  ;;  %v112_v6 = vld [vmem:[%s468_s3 + $0x10] sm:$0xff]  ;;  %vm125_vm2 = vcmask 523264   ;;  %vm211_vm3 = vcmask 261120   ;;  %vm285_vm4 = vcmask 31744  }
   0x2   :  { %v26_v2 = vld [vmem:[%s467_s0] sm:$0xff]  ;;  %314 = vmatpush3.msra.mxu0 %v27_v1  ;;  %348 = vmatprep.subr.bf16.mxu1 %v371_v4  ;;  %v113_v7 = vld [vmem:[%s468_s3 + $0x18] sm:$0xff]  ;;  %v115_v11 = vld [vmem:[%s468_s3 + $0x28] sm:$0xff] }
   0x3   :  { %v110_v3 = vld [vmem:[%s468_s3] sm:$0xff]  ;;  %316 = vmatmul.mubr.msk.f32.vlgmr.msra.gmra.mrb[0].mxu0 %vm35_vm0, %v26_v2  ;;  %334 = vmatprep.mubr.msk.f32.mxu1 %vm370_vm1, %v369_v0  ;;  %v352_v9 = vpack.c.bf16 %v113_v7, %v112_v6  ;;  %v116_v13 = vld [vmem:[%s468_s3 + $0x30] sm:$0xff]  ;;  %v117_v14 = vld [vmem:[%s468_s3 + $0x38] sm:$0xff] }
   0x4   :  { %v349_v8 = vpack.c.bf16 %v111_v5, %v110_v3  ;;  %360 = vmatprep.subr.bf16.mxu0 %v371_v4  ;;  %345 = vmatprep.mubr.msk.f32.mxu0 %vm370_vm1, %v369_v0  ;;  %v114_v10 = vld [vmem:[%s468_s3 + $0x20] sm:$0xff]  ;;  %v358_v15 = vpack.c.bf16 %v117_v14, %v116_v13  ;;  %v201_v17 = vld [vmem:[%s469_s5 + $0x8] sm:$0xff]  ;;  %v202_v24 = vld [vmem:[%s469_s5 + $0x10] sm:$0xff] }
   0x5   :  { %v355_v12 = vpack.c.bf16 %v115_v11, %v114_v10  ;;  %v200_v16 = vld [vmem:[%s469_s5] sm:$0xff]  ;;  %v203_v25 = vld [vmem:[%s469_s5 + $0x18] sm:$0xff] }
   0x6   :  { %350 = vmatpush3.bf16.msra.mxu1 %v349_v8  ;;  %v361_v18 = vpack.c.bf16 %v201_v17, %v200_v16  ;;  %v291_v19 = vld [vmem:[%s470_s2] ss:$0 sm:$0xff]  ;;  %v364_v26 = vpack.c.bf16 %v203_v25, %v202_v24 }
   0x7   :  { %351 = vmatprep.subr.bf16.mxu1 %v371_v4  ;;  %v293_v27 = vld [vmem:[%s471_s4] ss:$0 sm:$0xff] }
   0x8   :  { %362 = vmatpush3.bf16.msra.mxu0 %v361_v18  ;;  %v295_v32 = vld [vmem:[%s472_s6] ss:$0 sm:$0xff] }
   0x9   :  { %363 = vmatprep.subr.bf16.mxu0 %v371_v4 }
   0xa   :  { %353 = vmatpush3.bf16.msra.mxu1 %v352_v9 }
   0xb   :  { %354 = vmatprep.subr.bf16.mxu1 %v371_v4 }
   0xc   :  { %365 = vmatpush3.bf16.msra.mxu0 %v364_v26 }
   0xe   :  { %356 = vmatpush3.bf16.msra.mxu1 %v355_v12 }
   0xf   :  { %357 = vmatprep.subr.bf16.mxu1 %v371_v4 }
  0x12   :  { %359 = vmatpush3.bf16.msra.mxu1 %v358_v15 }
  0xd6   :  { %v105_v20 = vpop.f32.mrb[0].mxu0 }
  0xd7   :  { %v106_v21 = vadd.f32 %v291_v19, %v105_v20  ;;  %v317_v22 = vpop.f32.mrb[1].mxu0 }
  0xd9   :  { %v109_v23 = vmax.f32 %v106_v21, 0.0 }
  0xdb   :  { %335 = vmatmul.mubr.msk.f32.vlgmr.msra.gmra.mrb[0].mxu1 %vm125_vm2, %v109_v23 }
 0x1ae   :  { %v195_v28 = vpop.f32.mrb[0].mxu1 }
 0x1af   :  { %v196_v29 = vadd.f32 %v293_v27, %v195_v28  ;;  %v336_v30 = vpop.f32.mrb[1].mxu1 }
 0x1b1   :  { %v199_v31 = vmax.f32 %v196_v29, 0.0 }
 0x1b3   :  { %346 = vmatmul.mubr.msk.f32.vlgmr.msra.gmra.mrb[2].mxu0 %vm211_vm3, %v199_v31 }
 0x286   :  { %v281_v33 = vpop.f32.mrb[2].mxu0 }
 0x287   :  { %v282_v34 = vadd.f32 %v295_v32, %v281_v33  ;;  %v347_v35 = vpop.f32.mrb[3].mxu0 }
 0x289   :  { %286 = vst.msk [vmem:[%s473_s7] sm:$0xff] %vm285_vm4, %v282_v34 }

</bundles_post_ra>
